<compile_context>
chip_gen: v7x
topology: tpu7x:2x2x1
jax: 0.10.0
libtpu: 0.0.40
codegen_flags: <defaults>
</compile_context>

<pallas_src>
import functools

import jax
import jax.numpy as jnp
from jax.experimental import pallas as pl
from jax.experimental.pallas import tpu as pltpu


def _round_up(x, m):
    return (x + m - 1) // m * m


def _mlp_kernel(x_ref, w_ref, b_ref, out_ref, *, n0, r2, r3, P):
    """x_ref: [TB, n0] f32; w_ref: packed bf16 [R, P] slab of the three
    transposed+padded weights; b_ref: f32 [3, P] bias slab; out_ref: [TB, P]."""
    # Layer 1: Linear + ReLU  (full 128-lane-wide operands, no column slices)
    x = x_ref[...].astype(jnp.bfloat16)
    z1 = jnp.dot(x, w_ref[0:n0, :],
                 preferred_element_type=jnp.float32) + b_ref[0:1, :]
    a1 = jnp.maximum(z1, 0.0).astype(jnp.bfloat16)

    # Layer 2: Linear + ReLU
    z2 = jnp.dot(a1, w_ref[r2:r2 + P, :],
                 preferred_element_type=jnp.float32) + b_ref[1:2, :]
    a2 = jnp.maximum(z2, 0.0).astype(jnp.bfloat16)

    # Layer 3: Linear (no activation)
    z3 = jnp.dot(a2, w_ref[r3:r3 + P, :],
                 preferred_element_type=jnp.float32) + b_ref[2:3, :]

    # Lane-dense store of the full padded tile.
    out_ref[...] = z3.astype(out_ref.dtype)


def prepare_params(w1, b1, w2, b2, w3, b3):
    """One-time parameter prep (off the hot path).

    PyTorch layout wK: [out, in], bK: [out].  Returns:
      w_slab : bf16 [R, P]  -- three transposed weights, rows 8-aligned,
                               all padded to a common 128-multiple width P
      b_slab : f32  [3, P]  -- biases, one per row, zero-padded to P
      meta   : (n0, n3, row_offs, P)
    """
    n1, n0 = w1.shape
    n2 = w2.shape[0]
    n3 = w3.shape[0]
    P = _round_up(max(n1, n2, n3), 128)          # common padded lane width

    def block(w, in_pad):
        wt = jnp.asarray(w, jnp.float32).T                       # [in, out]
        wt = jnp.pad(wt, ((0, in_pad - wt.shape[0]),
                          (0, P - wt.shape[1])))
        return wt.astype(jnp.bfloat16)

    blk1 = block(w1, _round_up(n0, 8))   # [r(n0,8), P]
    blk2 = block(w2, P)                  # [P, P]  (input dim padded to P)
    blk3 = block(w3, P)                  # [P, P]
    row_offs = (0, blk1.shape[0], blk1.shape[0] + blk2.shape[0])
    w_slab = jnp.concatenate([blk1, blk2, blk3], axis=0)         # bf16 [R, P]

    def brow(b):
        b = jnp.asarray(b, jnp.float32)
        return jnp.pad(b, (0, P - b.shape[0]))[None, :]          # [1, P]

    b_slab = jnp.concatenate([brow(b1), brow(b2), brow(b3)], axis=0)  # [3, P]

    return w_slab, b_slab, (n0, n3, row_offs, P)


def make_mlp_forward(meta):
    """Build the jitted forward fn: (x, w_slab, b_slab) -> [B, n3] f32."""
    n0, n3, row_offs, P = meta
    _, r2, r3 = row_offs
    kernel = functools.partial(_mlp_kernel, n0=n0, r2=r2, r3=r3, P=P)

    @jax.jit
    def forward(x, w_slab, b_slab):
        B = x.shape[0]
        TB = min(256, _round_up(B, 8))           # rows per grid step
        B_pad = _round_up(B, TB)
        xp = x if B_pad == B else jnp.pad(x, ((0, B_pad - B), (0, 0)))
        R = w_slab.shape[0]

        out = pl.pallas_call(
            kernel,
            out_shape=jax.ShapeDtypeStruct((B_pad, P), jnp.float32),
            grid_spec=pltpu.PrefetchScalarGridSpec(
                num_scalar_prefetch=0,
                grid=(B_pad // TB,),
                in_specs=[
                    pl.BlockSpec((TB, n0), lambda i: (i, 0)),   # x rows
                    pl.BlockSpec((R, P), lambda i: (0, 0)),     # resident wts
                    pl.BlockSpec((3, P), lambda i: (0, 0)),     # resident bias
                ],
                out_specs=pl.BlockSpec((TB, P), lambda i: (i, 0)),
            ),
            compiler_params=pltpu.CompilerParams(
                dimension_semantics=("parallel",),
                vmem_limit_bytes=32 * 1024 * 1024,
            ),
        )(xp, w_slab, b_slab)

        # Wrapper-side trim of row/lane padding (free layout plumbing).
        return out[:B, :n3]

    return forward


def reference_forward(x, w1, b1, w2, b2, w3, b3):
    a1 = jnp.maximum(x @ w1.T + b1, 0.0)
    a2 = jnp.maximum(a1 @ w2.T + b2, 0.0)
    return a2 @ w3.T + b3


if __name__ == "__main__":
    # Small shapes consistent with Model(n_0, n_1, n_2, n_3)
    B, n0, n1, n2, n3 = 8, 32, 64, 32, 16

    key = jax.random.PRNGKey(0)
    kx, k1, k2, k3, kb1, kb2, kb3 = jax.random.split(key, 7)

    x = jax.random.normal(kx, (B, n0), dtype=jnp.float32)

    # PyTorch nn.Linear weight layout: [out, in]
    w1 = jax.random.normal(k1, (n1, n0), dtype=jnp.float32) * 0.1
    b1 = jax.random.normal(kb1, (n1,), dtype=jnp.float32) * 0.1
    w2 = jax.random.normal(k2, (n2, n1), dtype=jnp.float32) * 0.1
    b2 = jax.random.normal(kb2, (n2,), dtype=jnp.float32) * 0.1
    w3 = jax.random.normal(k3, (n3, n2), dtype=jnp.float32) * 0.1
    b3 = jax.random.normal(kb3, (n3,), dtype=jnp.float32) * 0.1

    # One-time parameter packing (off the per-call hot path).
    w_slab, b_slab, meta = prepare_params(w1, b1, w2, b2, w3, b3)
    w_slab = jax.block_until_ready(jax.device_put(w_slab))
    b_slab = jax.block_until_ready(jax.device_put(b_slab))

    forward = make_mlp_forward(meta)
    out = jax.block_until_ready(forward(x, w_slab, b_slab))

    ref = reference_forward(x, w1, b1, w2, b2, w3, b3)
    assert out.shape == (B, n3)
    # bf16 weights -> relaxed tolerance (accumulation is still f32).
    assert jnp.allclose(out, ref, atol=3e-2, rtol=3e-2), "mismatch vs reference"

    print("KERNEL_OK")
</pallas_src>

<mosaic_0001>
module attributes {stable_mosaic.version = 11 : i64} {
  func.func @_mlp_kernel(%arg0: i32, %arg1: memref<8x32xf32, #tpu.memory_space<vmem>>, %arg2: memref<288x128xbf16, #tpu.memory_space<vmem>>, %arg3: memref<3x128xf32, #tpu.memory_space<vmem>>, %arg4: memref<8x128xf32, #tpu.memory_space<vmem>>) attributes {dimension_semantics = [#tpu.dimension_semantics<parallel>], iteration_bounds = array<i64: 1>, scalar_prefetch = 0 : i64, scratch_operands = 0 : i64, tpu.core_type = #tpu.core_type<tc>, window_params = [{transform_indices = @transform_0, window_bounds = array<i64: 8, 32>}, {pipeline_mode = #tpu.pipeline_mode<synchronous>, transform_indices = @transform_1, window_bounds = array<i64: 288, 128>}, {pipeline_mode = #tpu.pipeline_mode<synchronous>, transform_indices = @transform_2, window_bounds = array<i64: 3, 128>}, {transform_indices = @transform_3, window_bounds = array<i64: 8, 128>}]} {
    %c0 = arith.constant 0 : index
    %c0_0 = arith.constant 0 : index
    %0 = vector.load %arg1[%c0, %c0_0] : memref<8x32xf32, #tpu.memory_space<vmem>>, vector<8x32xf32>
    %1 = arith.truncf %0 : vector<8x32xf32> to vector<8x32xbf16>
    %c0_1 = arith.constant 0 : index
    %c0_2 = arith.constant 0 : index
    %2 = vector.load %arg2[%c0_1, %c0_2] : memref<288x128xbf16, #tpu.memory_space<vmem>>, vector<32x128xbf16>
    %cst = arith.constant dense<0.000000e+00> : vector<8x128xf32>
    %3 = tpu.matmul %1, %2, %cst {dimension_numbers = #tpu.dot_dimension_numbers<[1], [0], [0], [1], [0, 0, 1, 1], [], []>} : vector<8x32xbf16>, vector<32x128xbf16>, vector<8x128xf32> -> vector<8x128xf32>
    %c0_3 = arith.constant 0 : index
    %c0_4 = arith.constant 0 : index
    %4 = vector.load %arg3[%c0_3, %c0_4] : memref<3x128xf32, #tpu.memory_space<vmem>>, vector<1x128xf32>
    %5 = vector.broadcast %4 : vector<1x128xf32> to vector<8x128xf32>
    %6 = arith.addf %3, %5 : vector<8x128xf32>
    %cst_5 = arith.constant 0.000000e+00 : f32
    %7 = vector.broadcast %cst_5 : f32 to vector<8x128xf32>
    %8 = arith.maximumf %6, %7 : vector<8x128xf32>
    %9 = arith.truncf %8 : vector<8x128xf32> to vector<8x128xbf16>
    %c32 = arith.constant 32 : index
    %c0_6 = arith.constant 0 : index
    %10 = vector.load %arg2[%c32, %c0_6] : memref<288x128xbf16, #tpu.memory_space<vmem>>, vector<128x128xbf16>
    %cst_7 = arith.constant dense<0.000000e+00> : vector<8x128xf32>
    %11 = tpu.matmul %9, %10, %cst_7 {dimension_numbers = #tpu.dot_dimension_numbers<[1], [0], [0], [1], [0, 0, 1, 1], [], []>} : vector<8x128xbf16>, vector<128x128xbf16>, vector<8x128xf32> -> vector<8x128xf32>
    %c1 = arith.constant 1 : index
    %c0_8 = arith.constant 0 : index
    %12 = vector.load %arg3[%c1, %c0_8] : memref<3x128xf32, #tpu.memory_space<vmem>>, vector<1x128xf32>
    %13 = vector.broadcast %12 : vector<1x128xf32> to vector<8x128xf32>
    %14 = arith.addf %11, %13 : vector<8x128xf32>
    %cst_9 = arith.constant 0.000000e+00 : f32
    %15 = vector.broadcast %cst_9 : f32 to vector<8x128xf32>
    %16 = arith.maximumf %14, %15 : vector<8x128xf32>
    %17 = arith.truncf %16 : vector<8x128xf32> to vector<8x128xbf16>
    %c160 = arith.constant 160 : index
    %c0_10 = arith.constant 0 : index
    %18 = vector.load %arg2[%c160, %c0_10] : memref<288x128xbf16, #tpu.memory_space<vmem>>, vector<128x128xbf16>
    %cst_11 = arith.constant dense<0.000000e+00> : vector<8x128xf32>
    %19 = tpu.matmul %17, %18, %cst_11 {dimension_numbers = #tpu.dot_dimension_numbers<[1], [0], [0], [1], [0, 0, 1, 1], [], []>} : vector<8x128xbf16>, vector<128x128xbf16>, vector<8x128xf32> -> vector<8x128xf32>
    %c2 = arith.constant 2 : index
    %c0_12 = arith.constant 0 : index
    %20 = vector.load %arg3[%c2, %c0_12] : memref<3x128xf32, #tpu.memory_space<vmem>>, vector<1x128xf32>
    %21 = vector.broadcast %20 : vector<1x128xf32> to vector<8x128xf32>
    %22 = arith.addf %19, %21 : vector<8x128xf32>
    %c0_13 = arith.constant 0 : index
    %c0_14 = arith.constant 0 : index
    %23 = vector.load %arg4[%c0_13, %c0_14] : memref<8x128xf32, #tpu.memory_space<vmem>>, vector<8x128xf32>
    tpu.vector_store %arg4[%c0_13, %c0_14], %22 {strides = array<i32>} : memref<8x128xf32, #tpu.memory_space<vmem>>, vector<8x128xf32>,
    return
  }
  func.func @transform_0(%arg0: i32) -> (i32, i32) {
    %c0_i32 = arith.constant 0 : i32
    %c0_i32_0 = arith.constant 0 : i32
    return %arg0, %c0_i32 : i32, i32
  }
  func.func @transform_1(%arg0: i32) -> (i32, i32) {
    %c0_i32 = arith.constant 0 : i32
    %c0_i32_0 = arith.constant 0 : i32
    %c0_i32_1 = arith.constant 0 : i32
    return %c0_i32, %c0_i32_0 : i32, i32
  }
  func.func @transform_2(%arg0: i32) -> (i32, i32) {
    %c0_i32 = arith.constant 0 : i32
    %c0_i32_0 = arith.constant 0 : i32
    %c0_i32_1 = arith.constant 0 : i32
    return %c0_i32, %c0_i32_0 : i32, i32
  }
  func.func @transform_3(%arg0: i32) -> (i32, i32) {
    %c0_i32 = arith.constant 0 : i32
    %c0_i32_0 = arith.constant 0 : i32
    return %arg0, %c0_i32 : i32, i32
  }
}

</mosaic_0001>

<bundles_post_ra>
// kernel: forward.1
= control target key start
LH: loop header
LB: loop body
LE: loop exit
PB: predicated region body
PF: predicated region fallthrough
CT: control target
= control target key end

     0   :  { %8 = vsyncpa [#allocation3], 0  ;;  %s639_s0 = inlined_call_operand.hbm [shape: f32[8,32], index: 0, kind: input, shape index: {}]   ;;  %s640_s1 = inlined_call_operand.hbm [shape: bf16[288,128], index: 1, kind: input, shape index: {}]   ;;  %s641_s2 = inlined_call_operand.vmem [shape: f32[3,128], index: 2, kind: input, shape index: {}]   ;;  %s642_s3 = inlined_call_operand.hbm [shape: f32[8,128], index: 3, kind: output, shape index: {}]  }
   0x1   :  { %9 = vsyncpa [#allocation6], 0 }
   0x2   :  { %10 = vsyncpa [#allocation4], 0  ;;  %s536_s12 = smov [#allocation2]   ;;  %s537_s14 = smov [#allocation5]  }
   0x3   :  { %s17_s13 = sshll.u32 %s536_s12, 4  ;;  %s26_s15 = sshll.u32 %s537_s14, 4  ;;  %s18_s13 = int_to_ptr.vmem [resolvable:$true] %s17_s13  ;;  %s563_s15 = int_to_ptr.vmem [resolvable:$true] %s26_s15 }
   0x4   :  { %s464_s18 = scalar_lea.hbm %s639_s0, 128 }
   0x5   :  { %p465_p0 = scmp.ne.s32.totalorder %s639_s0, %s464_s18  ;;  %p468_p1 = scmp.lt.u32.totalorder %s464_s18, %s639_s0 }
   0x7   :  { %p470_p2 = pnand %p468_p1, %p465_p0 }
   0x9   :  { %473 = shalt.err (!%p470_p2)
}
   0xa   :  { %s474_s23 = scalar_lea.vmem %s18_s13, 128  ;;  %p479_p4 = scmp.lt.s32.totalorder %s18_s13, %s18_s13 }
   0xb   :  { %p475_p3 = scmp.ne.s32.totalorder %s18_s13, %s474_s23  ;;  %p480_p5 = scmp.lt.s32.totalorder %s474_s23, %s474_s23 }
   0xd   :  { %p481_p6 = por %p480_p5, %p479_p4 }
   0xf   :  { %p482_p7 = pnand %p481_p6, %p475_p3 }
  0x11   :  { %485 = shalt.err (!%p482_p7)
}
  0x12   :  { %20 = dma.hbm_to_vmem [thread:$0]  %s639_s0, 128, %s18_s13, [#allocation3]  }
  0x13   :  { %s486_s28 = scalar_lea.hbm %s640_s1, 2304 }
  0x14   :  { %p487_p8 = scmp.ne.s32.totalorder %s640_s1, %s486_s28  ;;  %p490_p9 = scmp.lt.u32.totalorder %s486_s28, %s640_s1 }
  0x16   :  { %p492_p10 = pnand %p490_p9, %p487_p8 }
  0x18   :  { %495 = shalt.err (!%p492_p10)
}
  0x19   :  { %s496_s6 = scalar_lea.vmem %s563_s15, 2304  ;;  %p501_p12 = scmp.lt.s32.totalorder %s563_s15, %s563_s15 }
  0x1a   :  { %p497_p11 = scmp.ne.s32.totalorder %s563_s15, %s496_s6  ;;  %p502_p13 = scmp.lt.s32.totalorder %s496_s6, %s496_s6 }
  0x1c   :  { %p503_p0 = por %p502_p13, %p501_p12 }
  0x1e   :  { %p504_p1 = pnand %p503_p0, %p497_p11 }
  0x20   :  { %507 = shalt.err (!%p504_p1)
}
  0x21   :  { %s538_s0 = smov 64   ;;  %s539_s7 = smov 4  }
  0x22   :  { %32 = dma.hbm_to_vmem [thread:$0]  %s640_s1, 2304, %s563_s15, [#allocation6], %s538_s0, %s538_s0, %s539_s7  }
  0x23   :  { %530 = dma.done.wait [#allocation3], 128  }
  0x24   :  { %531 = vsyncadd [#allocation3], 4294967168 }
  0x25   :  { %532 = dma.done.wait [#allocation6], 2304  }
  0x26   :  { %533 = vsyncadd [#allocation6], 4294964992  ;;  %v540_v0 = vmov 0.0   ;;  %vm541_vm0 = vmmov 0   ;;  %v446_v1 = vld [vmem:[#allocation5] sm:$0xff]   ;;  %v447_v2 = vld [vmem:[#allocation5 + $0x8] sm:$0xff]  }
  0x27   :  { %391 = vmatprep.subr.bf16.mxu0 %v540_v0  ;;  %395 = vmatprep.mubr.msk.bf16.mxu0 %vm541_vm0, %v540_v0  ;;  %v42_v3 = vld [vmem:[#allocation2] sm:$0xff]  ;;  %v448_v4 = vld [vmem:[#allocation5 + $0x10] sm:$0xff]   ;;  %vm65_vm1 = vcmask 261120   ;;  %v450_v7 = vld [vmem:[#allocation5 + $0x20] sm:$0xff]   ;;  %s542_s15 = smov [#allocation7]  }
  0x28   :  { %399 = vmatprep.subr.bf16.mxu1 %v540_v0  ;;  %415 = vmatprep.mubr.msk.bf16.mxu1 %vm541_vm0, %v540_v0  ;;  %v43_v5 = vpack.c.bf16 %v42_v3, %v42_v3  ;;  %v449_v6 = vld [vmem:[#allocation5 + $0x18] sm:$0xff]   ;;  %v451_v8 = vld [vmem:[#allocation5 + $0x28] sm:$0xff]   ;;  %v452_v9 = vld [vmem:[#allocation5 + $0x30] sm:$0xff]   ;;  %s338_s16 = sshll.u32 %s542_s15, 4  ;;  %s339_s16 = int_to_ptr.vmem [resolvable:$true] %s338_s16 }
  0x29   :  { %392 = vmatpush3.bf16.msra.mxu0 %v446_v1  ;;  %400 = vmatpush3.bf16.msra.mxu1 %v448_v4  ;;  %v453_v10 = vld [vmem:[#allocation5 + $0x38] sm:$0xff]   ;;  %v454_v11 = vld [vmem:[#allocation5 + $0x40] sm:$0xff]   ;;  %v455_v12 = vld [vmem:[#allocation5 + $0x48] sm:$0xff]   ;;  %s508_s17 = scalar_lea.vmem %s339_s16, 128  ;;  %p513_p3 = scmp.lt.s32.totalorder %s339_s16, %s339_s16 }
  0x2a   :  { %393 = vmatprep.subr.bf16.mxu0 %v540_v0  ;;  %401 = vmatprep.subr.bf16.mxu1 %v540_v0  ;;  %v456_v13 = vld [vmem:[#allocation5 + $0x50] sm:$0xff]   ;;  %v457_v14 = vld [vmem:[#allocation5 + $0x58] sm:$0xff]   ;;  %v458_v15 = vld [vmem:[#allocation5 + $0x60] sm:$0xff]   ;;  %p509_p2 = scmp.ne.s32.totalorder %s339_s16, %s508_s17  ;;  %p514_p4 = scmp.lt.s32.totalorder %s508_s17, %s508_s17 }
  0x2b   :  { %v459_v16 = vld [vmem:[#allocation5 + $0x68] sm:$0xff]   ;;  %v460_v17 = vld [vmem:[#allocation5 + $0x70] sm:$0xff]   ;;  %v461_v18 = vld [vmem:[#allocation5 + $0x78] sm:$0xff]  }
  0x2c   :  { %v348_v19 = vld [vmem:[%s641_s2] ss:$0 sm:$0xff]  ;;  %v462_v27 = vld [vmem:[#allocation5 + $0x80] sm:$0xff]   ;;  %v463_v28 = vld [vmem:[#allocation5 + $0x88] sm:$0xff]   ;;  %p515_p5 = por %p514_p4, %p513_p3 }
  0x2d   :  { %394 = vmatpush3.bf16.msra.mxu0 %v447_v2  ;;  %402 = vmatpush3.bf16.msra.mxu1 %v449_v6  ;;  %v352_v29 = vld [vmem:[%s641_s2 + $0x1] ss:$0 sm:$0xff]  ;;  %v361_v37 = vld [vmem:[%s641_s2 + $0x2] ss:$0 sm:$0xff] }
  0x2e   :  { %419 = vmatprep.subr.bf16.mxu0 %v540_v0  ;;  %403 = vmatprep.subr.bf16.mxu1 %v540_v0  ;;  %p516_p6 = pnand %p515_p5, %p509_p2 }
  0x30   :  { %396 = vmatmul.mubr.msk.bf16.vlgmr.msra.gmra.mrb[0].mxu0 %vm65_vm1, %v43_v5 }
  0x31   :  { %435 = vmatprep.mubr.msk.bf16.mxu0 %vm541_vm0, %v540_v0  ;;  %404 = vmatpush3.bf16.msra.mxu1 %v450_v7 }
  0x32   :  { %405 = vmatprep.subr.bf16.mxu1 %v540_v0  ;;  %420 = vmatpush3.bf16.msra.mxu0 %v456_v13 }
  0x33   :  { %421 = vmatprep.subr.bf16.mxu0 %v540_v0 }
  0x35   :  { %406 = vmatpush3.bf16.msra.mxu1 %v451_v8 }
  0x36   :  { %407 = vmatprep.subr.bf16.mxu1 %v540_v0  ;;  %422 = vmatpush3.bf16.msra.mxu0 %v457_v14 }
  0x37   :  { %423 = vmatprep.subr.bf16.mxu0 %v540_v0 }
  0x39   :  { %408 = vmatpush3.bf16.msra.mxu1 %v452_v9 }
  0x3a   :  { %409 = vmatprep.subr.bf16.mxu1 %v540_v0  ;;  %424 = vmatpush3.bf16.msra.mxu0 %v458_v15 }
  0x3b   :  { %425 = vmatprep.subr.bf16.mxu0 %v540_v0 }
  0x3d   :  { %410 = vmatpush3.bf16.msra.mxu1 %v453_v10 }
  0x3e   :  { %411 = vmatprep.subr.bf16.mxu1 %v540_v0  ;;  %426 = vmatpush3.bf16.msra.mxu0 %v459_v16 }
  0x3f   :  { %427 = vmatprep.subr.bf16.mxu0 %v540_v0 }
  0x41   :  { %412 = vmatpush3.bf16.msra.mxu1 %v454_v11 }
  0x42   :  { %413 = vmatprep.subr.bf16.mxu1 %v540_v0  ;;  %428 = vmatpush3.bf16.msra.mxu0 %v460_v17 }
  0x43   :  { %429 = vmatprep.subr.bf16.mxu0 %v540_v0 }
  0x45   :  { %414 = vmatpush3.bf16.msra.mxu1 %v455_v12 }
  0x46   :  { %430 = vmatpush3.bf16.msra.mxu0 %v461_v18 }
  0x47   :  { %431 = vmatprep.subr.bf16.mxu0 %v540_v0 }
  0x4a   :  { %432 = vmatpush3.bf16.msra.mxu0 %v462_v27 }
  0x4b   :  { %433 = vmatprep.subr.bf16.mxu0 %v540_v0 }
  0x4e   :  { %434 = vmatpush3.bf16.msra.mxu0 %v463_v28 }
 0x103   :  { %v103_v20 = vpop.f32.mrb[0].mxu0 }
 0x104   :  { %v104_v21 = vadd.f32 %v348_v19, %v103_v20  ;;  %v397_v22 = vpop.f32.mrb[1].mxu0 }
 0x105   :  { %v106_v23 = vpop.f32.mrb[2].mxu0 }
 0x106   :  { %v109_v24 = vmax.f32 %v104_v21, 0.0  ;;  %v398_v25 = vpop.f32.mrb[3].mxu0 }
 0x108   :  { %v110_v26 = vpack.c.bf16 %v109_v24, %v109_v24 }
 0x10a   :  { %416 = vmatmul.mubr.bf16.vlgmr.msra.gmra.mrb[0].mxu1 %v110_v26 }
 0x1dd   :  { %v214_v30 = vpop.f32.mrb[0].mxu1 }
 0x1de   :  { %v215_v31 = vadd.f32 %v352_v29, %v214_v30  ;;  %v417_v32 = vpop.f32.mrb[1].mxu1 }
 0x1df   :  { %v217_v33 = vpop.f32.mrb[2].mxu1 }
 0x1e0   :  { %v220_v34 = vmax.f32 %v215_v31, 0.0  ;;  %v418_v35 = vpop.f32.mrb[3].mxu1 }
 0x1e2   :  { %v221_v36 = vpack.c.bf16 %v220_v34, %v220_v34 }
 0x1e4   :  { %436 = vmatmul.mubr.bf16.vlgmr.msra.gmra.mrb[4].mxu0 %v221_v36 }
 0x2b7   :  { %v325_v38 = vpop.f32.mrb[4].mxu0 }
 0x2b8   :  { %v326_v39 = vadd.f32 %v361_v37, %v325_v38  ;;  %v437_v40 = vpop.f32.mrb[5].mxu0 }
 0x2b9   :  { %v328_v41 = vpop.f32.mrb[6].mxu0 }
 0x2ba   :  { %331 = vst [vmem:[#allocation7] sm:$0xff] %v326_v39  ;;  %v438_v42 = vpop.f32.mrb[7].mxu0 }
 0x2bb   :  { %519 = shalt.err (!%p516_p6)
}
 0x2bc   :  { %s520_s2 = scalar_lea.hbm %s642_s3, 128 }
 0x2bd   :  { %p521_p7 = scmp.ne.s32.totalorder %s642_s3, %s520_s2  ;;  %p524_p8 = scmp.lt.u32.totalorder %s520_s2, %s642_s3 }
 0x2bf   :  { %p526_p9 = pnand %p524_p8, %p521_p7 }
 0x2c1   :  { %529 = shalt.err (!%p526_p9)
}
 0x2c2   :  { %341 = dma.vmem_to_hbm [thread:$0]  %s339_s16, 128, %s642_s3, [#allocation4]  }
 0x2c3   :  { %534 = dma.done.wait [#allocation4], 128  }
 0x2c4   :  { %535 = vsyncadd [#allocation4], 4294967168 }
 0x2c5   :  { %345 = vsyncpa [#allocation3], 1 }
 0x2c6   :  { %346 = vsyncpa [#allocation6], 1 }
 0x2c7   :  { %347 = vsyncpa [#allocation4], 1 }

</bundles_post_ra>
